<compile_context>
chip_gen: v6e
topology: v6e:2x2x1
jax: 0.10.0
libtpu: 0.0.40
codegen_flags: <defaults>
</compile_context>

<pallas_src>
from functools import partial

import jax
import jax.numpy as jnp
from jax.experimental import pallas as pl
from jax.experimental.pallas import tpu as pltpu

LANE = 128            # lane width: fc0 hidden width and padded width of every stage
SUB_BF16 = 16         # bf16 sublane packing: batch tiles are multiples of 16 rows
SUB_F32 = 8           # f32 sublane packing (bias slab rows)
BIAS_LANE = LANE - 1  # constant-1 lane of the packed input (carries folded biases)
MAX_TB = 512          # rows per grid step (>=512 reaches ~85% of HBM roofline)


def _round_up(n, m):
    return ((n + m - 1) // m) * m


def _dqnwmt_kernel(x_ref, w_small_ref, w_fc0_ref, b_head_ref, out_ref):
    """Fused DQNWMT forward for one (TB, 128) batch tile.

    x_ref       : (TB, 128)  bf16   packed rows [p | r | oo | c | mem | 0-pad | 1]
    w_small_ref : (2,128,128) bf16  [0] block-diag preproc weight (+bias in row 127)
                                    [1] fused head || memorizer weight
    w_fc0_ref   : (256, 128) bf16   merged fc0: rows 0:128 consume the relu'd
                                    preproc lanes, rows 128:256 consume x directly
                                    (c, mem, and fc0 bias via the constant-1 lane)
    b_head_ref  : (8, 128)   f32    row 0 = head || memorizer bias
    out_ref     : (TB, 128)  f32    cols 0:2 = y, cols 2:2+memory_size = new memory
    """
    f32 = jnp.float32
    x = x_ref[...]                                               # (TB, 128) bf16

    # pre = relu([p,r,oo] through the block-diagonal preproc weight); the
    # preproc bias rides on the constant-1 lane (row 127 of the slab).
    pre = jnp.dot(x, w_small_ref[0], preferred_element_type=f32)
    pre = jnp.maximum(pre, 0.0).astype(jnp.bfloat16)             # lanes >=96 stay 0

    # h = relu(fc0(concat([p_proc, r_proc, oo_proc, c, mem]))) as ONE K=256 dot;
    # the fc0 bias rides on x's constant-1 lane (row 255 of the slab).
    hin = jnp.concatenate([pre, x], axis=-1)                     # (TB, 256) bf16
    h = jnp.dot(hin, w_fc0_ref[...], preferred_element_type=f32)
    h = jnp.maximum(h, 0.0).astype(jnp.bfloat16)

    # Fused head || memorizer: one lane-dense (TB, 128) f32 store.
    out_ref[...] = (jnp.dot(h, w_small_ref[1], preferred_element_type=f32)
                    + b_head_ref[0:1, :])


def init_params(key, n_omega, n_upsilon, preprocdim=32, memory_size=32):
    """Deterministic nn.Linear-style init (uniform +/- 1/sqrt(fan_in)) plus the
    packed bf16 slabs consumed by the kernel."""
    hid = 128
    d_in0 = preprocdim * 3 + 1 + memory_size              # fc0 fan-in (concat width)
    d_in = n_omega + n_upsilon + n_omega + 1 + memory_size  # packed input width
    d_pre = 3 * preprocdim                                 # preproc output width
    d_out = 2 + memory_size                                # fused head output width
    assert hid == LANE, "fc0 hidden width must be 128 for this packing"
    assert d_in <= BIAS_LANE and d_pre <= LANE and d_out <= LANE

    def lin(k, fan_in, fan_out):
        k1, k2 = jax.random.split(k)
        bound = 1.0 / float(fan_in) ** 0.5
        w = jax.random.uniform(k1, (fan_in, fan_out), jnp.float32, -bound, bound)
        b = jax.random.uniform(k2, (fan_out,), jnp.float32, -bound, bound)
        return w, b

    keys = jax.random.split(key, 6)
    wp, bp = lin(keys[0], n_omega, preprocdim)
    wr, br = lin(keys[1], n_upsilon, preprocdim)
    woo, boo = lin(keys[2], n_omega, preprocdim)
    w0, b0 = lin(keys[3], d_in0, hid)
    wh, bh = lin(keys[4], hid, 2)
    wm, bm = lin(keys[5], hid, memory_size)

    # Lane offsets of each field inside the packed input slab x = [p|r|oo|c|mem|0|1].
    o_p, o_r = 0, n_omega
    o_oo = o_r + n_upsilon
    o_c = o_oo + n_omega
    o_m = o_c + 1

    # Slab w_small[0]: block-diagonal preproc weight; preproc bias folded into
    # the constant-1 lane's row.
    w_pre = jnp.zeros((LANE, LANE), jnp.float32)
    w_pre = w_pre.at[o_p:o_p + n_omega, 0:preprocdim].set(wp)
    w_pre = w_pre.at[o_r:o_r + n_upsilon, preprocdim:2 * preprocdim].set(wr)
    w_pre = w_pre.at[o_oo:o_oo + n_omega, 2 * preprocdim:3 * preprocdim].set(woo)
    w_pre = w_pre.at[BIAS_LANE, 0:d_pre].set(jnp.concatenate([bp, br, boo]))

    # Merged fc0 slab (256, 128): rows 0:128 consume pre, rows 128:256 consume x.
    w0_pre = w0[0:d_pre]                   # fc0 rows fed by relu'd preproc outputs
    w0_c = w0[d_pre:d_pre + 1]             # fc0 row fed by the raw c lane
    w0_m = w0[d_pre + 1:]                  # fc0 rows fed by the raw mem lanes
    w_fc0 = jnp.zeros((2 * LANE, LANE), jnp.float32)
    w_fc0 = w_fc0.at[0:d_pre, :].set(w0_pre)
    w_fc0 = w_fc0.at[LANE + o_c:LANE + o_c + 1, :].set(w0_c)
    w_fc0 = w_fc0.at[LANE + o_m:LANE + o_m + memory_size, :].set(w0_m)
    w_fc0 = w_fc0.at[LANE + BIAS_LANE, :].set(b0)   # fc0 bias via constant-1 lane

    # Slab w_small[1]: fused head || memorizer.
    w_head = jnp.zeros((LANE, LANE), jnp.float32)
    w_head = w_head.at[:, 0:2].set(wh)
    w_head = w_head.at[:, 2:2 + memory_size].set(wm)

    w_small = jnp.stack([w_pre, w_head]).astype(jnp.bfloat16)     # (2, 128, 128)
    w_fc0 = w_fc0.astype(jnp.bfloat16)                            # (256, 128)

    b_head = jnp.zeros((SUB_F32, LANE), jnp.float32)
    b_head = b_head.at[0, 0:2].set(bh)
    b_head = b_head.at[0, 2:2 + memory_size].set(bm)

    raw = dict(wp=wp, bp=bp, wr=wr, br=br, woo=woo, boo=boo,
               w0=w0, b0=b0, wh=wh, bh=bh, wm=wm, bm=bm)
    return dict(w_small=w_small, w_fc0=w_fc0, b_head=b_head,
                d_in=d_in, memory_size=memory_size, raw=raw)


@partial(jax.jit, static_argnames=("d_in", "memory_size"))
def _forward_impl(w_small, w_fc0, b_head, p, r, oo, c, mem, *, d_in, memory_size):
    B = p.shape[0]
    TB = min(MAX_TB, _round_up(B, SUB_BF16))
    B_pad = _round_up(B, TB)

    # One packed, lane-dense, bf16 input slab [p | r | oo | c | mem | 0-pad | 1],
    # built in a single concatenate inside this jit (no double materialization).
    pad_cols = LANE - d_in - 1
    x = jnp.concatenate(
        [p.astype(jnp.float32), r.astype(jnp.float32), oo.astype(jnp.float32),
         c.astype(jnp.float32), mem.astype(jnp.float32),
         jnp.zeros((B, pad_cols), jnp.float32),
         jnp.ones((B, 1), jnp.float32)],                 # constant-1 bias lane
        axis=1).astype(jnp.bfloat16)
    x = jnp.pad(x, ((0, B_pad - B), (0, 0)))

    out = pl.pallas_call(
        _dqnwmt_kernel,
        out_shape=jax.ShapeDtypeStruct((B_pad, LANE), jnp.float32),
        grid=(B_pad // TB,),
        in_specs=[
            pl.BlockSpec((TB, LANE), lambda i: (i, 0)),            # batch tile
            pl.BlockSpec((2, LANE, LANE), lambda i: (0, 0, 0)),    # resident weights
            pl.BlockSpec((2 * LANE, LANE), lambda i: (0, 0)),      # resident fc0 slab
            pl.BlockSpec((SUB_F32, LANE), lambda i: (0, 0)),       # resident head bias
        ],
        out_specs=pl.BlockSpec((TB, LANE), lambda i: (i, 0)),
        compiler_params=pltpu.CompilerParams(
            dimension_semantics=("parallel",)),
    )(x, w_small, w_fc0, b_head)

    y = out[:B, 0:2]
    new_mem = out[:B, 2:2 + memory_size]
    return y, new_mem


def dqnwmt_forward(params, p, r, oo, c, mem):
    """Returns (y, new_memory).

    `mem` is x['mem'] (opti=True), or the module's persistent self.memory
    (opti=False; PyTorch uses a (1, memory_size) buffer there, i.e. batch 1 —
    broadcast it to the batch before calling and carry new_memory forward).
    """
    assert mem.shape[0] == p.shape[0] and mem.shape[1] == params["memory_size"]
    return _forward_impl(
        params["w_small"], params["w_fc0"], params["b_head"],
        p, r, oo, c, mem,
        d_in=params["d_in"], memory_size=params["memory_size"])


def _ref_forward(params, p, r, oo, c, mem):
    """Pure-JAX reference of the PyTorch forward.  Weights and inputs are
    rounded to bf16 to mirror the kernel's storage precision; math in f32."""
    bf = lambda a: a.astype(jnp.bfloat16).astype(jnp.float32)
    q = {k: bf(v) for k, v in params["raw"].items()}
    p, r, oo, c, mem = map(bf, (p, r, oo, c, mem))
    pp = jax.nn.relu(p @ q["wp"] + q["bp"])
    rr = jax.nn.relu(r @ q["wr"] + q["br"])
    ooo = jax.nn.relu(oo @ q["woo"] + q["boo"])
    hcat = jnp.concatenate([pp, rr, ooo, c, mem], axis=1)
    h = jax.nn.relu(hcat @ q["w0"] + q["b0"])
    y = h @ q["wh"] + q["bh"]
    new_mem = h @ q["wm"] + q["bm"]
    return y, new_mem


if __name__ == "__main__":
    n_omega, n_upsilon = 16, 8
    preprocdim, memory_size = 32, 32

    key = jax.random.PRNGKey(0)
    kparam, kdata = jax.random.split(key)
    params = init_params(kparam, n_omega, n_upsilon, preprocdim, memory_size)

    def make_inputs(k, B):
        kp, kr, koo, kc, km = jax.random.split(k, 5)
        p = jax.random.normal(kp, (B, n_omega), jnp.float32)
        r = jax.random.normal(kr, (B, n_upsilon), jnp.float32)
        oo = jax.random.normal(koo, (B, n_omega), jnp.float32)
        c = jax.random.normal(kc, (B, 1), jnp.float32)
        mem = jax.random.normal(km, (B, memory_size), jnp.float32)  # x['mem'] path
        return p, r, oo, c, mem

    # B=2: the module's small-batch use case (single grid step).
    # B=600: exercises the multi-tile batch grid (TB=512, grid=2).
    for B, kd in zip((2, 600), jax.random.split(kdata, 2)):
        inputs = make_inputs(kd, B)
        y, new_mem = dqnwmt_forward(params, *inputs)
        jax.block_until_ready((y, new_mem))

        y_ref, mem_ref = _ref_forward(params, *inputs)
        assert y.shape == (B, 2) and new_mem.shape == (B, memory_size)
        assert jnp.allclose(y, y_ref, atol=2e-2, rtol=2e-2)
        assert jnp.allclose(new_mem, mem_ref, atol=2e-2, rtol=2e-2)

    print("KERNEL_OK")
</pallas_src>

<mosaic_0001>
module attributes {stable_mosaic.version = 11 : i64} {
  func.func @_dqnwmt_kernel(%arg0: i32, %arg1: memref<16x128xbf16, #tpu.memory_space<vmem>>, %arg2: memref<2x128x128xbf16, #tpu.memory_space<vmem>>, %arg3: memref<256x128xbf16, #tpu.memory_space<vmem>>, %arg4: memref<8x128xf32, #tpu.memory_space<vmem>>, %arg5: memref<16x128xf32, #tpu.memory_space<vmem>>) attributes {dimension_semantics = [#tpu.dimension_semantics<parallel>], iteration_bounds = array<i64: 1>, scalar_prefetch = 0 : i64, scratch_operands = 0 : i64, tpu.core_type = #tpu.core_type<tc>, window_params = [{transform_indices = @transform_0, window_bounds = array<i64: 16, 128>}, {pipeline_mode = #tpu.pipeline_mode<synchronous>, transform_indices = @transform_1, window_bounds = array<i64: 2, 128, 128>}, {pipeline_mode = #tpu.pipeline_mode<synchronous>, transform_indices = @transform_2, window_bounds = array<i64: 256, 128>}, {pipeline_mode = #tpu.pipeline_mode<synchronous>, transform_indices = @transform_3, window_bounds = array<i64: 8, 128>}, {transform_indices = @transform_4, window_bounds = array<i64: 16, 128>}]} {
    %c0 = arith.constant 0 : index
    %c0_0 = arith.constant 0 : index
    %0 = vector.load %arg1[%c0, %c0_0] : memref<16x128xbf16, #tpu.memory_space<vmem>>, vector<16x128xbf16>
    %c0_1 = arith.constant 0 : index
    %c0_2 = arith.constant 0 : index
    %c0_3 = arith.constant 0 : index
    %1 = vector.load %arg2[%c0_1, %c0_2, %c0_3] : memref<2x128x128xbf16, #tpu.memory_space<vmem>>, vector<1x128x128xbf16>
    %2 = vector.shape_cast %1 : vector<1x128x128xbf16> to vector<128x128xbf16>
    %cst = arith.constant dense<0.000000e+00> : vector<16x128xf32>
    %3 = tpu.matmul %0, %2, %cst {dimension_numbers = #tpu.dot_dimension_numbers<[1], [0], [0], [1], [0, 0, 1, 1], [], []>} : vector<16x128xbf16>, vector<128x128xbf16>, vector<16x128xf32> -> vector<16x128xf32>
    %cst_4 = arith.constant 0.000000e+00 : f32
    %4 = vector.broadcast %cst_4 : f32 to vector<16x128xf32>
    %5 = arith.maximumf %3, %4 : vector<16x128xf32>
    %6 = arith.truncf %5 : vector<16x128xf32> to vector<16x128xbf16>
    %7 = tpu.concatenate %6, %0 in 1 : vector<16x128xbf16>, vector<16x128xbf16> -> vector<16x256xbf16>
    %c0_5 = arith.constant 0 : index
    %c0_6 = arith.constant 0 : index
    %8 = vector.load %arg3[%c0_5, %c0_6] : memref<256x128xbf16, #tpu.memory_space<vmem>>, vector<256x128xbf16>
    %cst_7 = arith.constant dense<0.000000e+00> : vector<16x128xf32>
    %9 = tpu.matmul %7, %8, %cst_7 {dimension_numbers = #tpu.dot_dimension_numbers<[1], [0], [0], [1], [0, 0, 1, 1], [], []>} : vector<16x256xbf16>, vector<256x128xbf16>, vector<16x128xf32> -> vector<16x128xf32>
    %cst_8 = arith.constant 0.000000e+00 : f32
    %10 = vector.broadcast %cst_8 : f32 to vector<16x128xf32>
    %11 = arith.maximumf %9, %10 : vector<16x128xf32>
    %12 = arith.truncf %11 : vector<16x128xf32> to vector<16x128xbf16>
    %c1 = arith.constant 1 : index
    %c0_9 = arith.constant 0 : index
    %c0_10 = arith.constant 0 : index
    %13 = vector.load %arg2[%c1, %c0_9, %c0_10] : memref<2x128x128xbf16, #tpu.memory_space<vmem>>, vector<1x128x128xbf16>
    %14 = vector.shape_cast %13 : vector<1x128x128xbf16> to vector<128x128xbf16>
    %cst_11 = arith.constant dense<0.000000e+00> : vector<16x128xf32>
    %15 = tpu.matmul %12, %14, %cst_11 {dimension_numbers = #tpu.dot_dimension_numbers<[1], [0], [0], [1], [0, 0, 1, 1], [], []>} : vector<16x128xbf16>, vector<128x128xbf16>, vector<16x128xf32> -> vector<16x128xf32>
    %c0_12 = arith.constant 0 : index
    %c0_13 = arith.constant 0 : index
    %16 = vector.load %arg4[%c0_12, %c0_13] : memref<8x128xf32, #tpu.memory_space<vmem>>, vector<1x128xf32>
    %17 = vector.broadcast %16 : vector<1x128xf32> to vector<16x128xf32>
    %18 = arith.addf %15, %17 : vector<16x128xf32>
    %c0_14 = arith.constant 0 : index
    %c0_15 = arith.constant 0 : index
    %19 = vector.load %arg5[%c0_14, %c0_15] : memref<16x128xf32, #tpu.memory_space<vmem>>, vector<16x128xf32>
    tpu.vector_store %arg5[%c0_14, %c0_15], %18 {strides = array<i32>} : memref<16x128xf32, #tpu.memory_space<vmem>>, vector<16x128xf32>,
    return
  }
  func.func @transform_0(%arg0: i32) -> (i32, i32) {
    %c0_i32 = arith.constant 0 : i32
    %c0_i32_0 = arith.constant 0 : i32
    return %arg0, %c0_i32 : i32, i32
  }
  func.func @transform_1(%arg0: i32) -> (i32, i32, i32) {
    %c0_i32 = arith.constant 0 : i32
    %c0_i32_0 = arith.constant 0 : i32
    %c0_i32_1 = arith.constant 0 : i32
    %c0_i32_2 = arith.constant 0 : i32
    return %c0_i32, %c0_i32_0, %c0_i32_1 : i32, i32, i32
  }
  func.func @transform_2(%arg0: i32) -> (i32, i32) {
    %c0_i32 = arith.constant 0 : i32
    %c0_i32_0 = arith.constant 0 : i32
    %c0_i32_1 = arith.constant 0 : i32
    return %c0_i32, %c0_i32_0 : i32, i32
  }
  func.func @transform_3(%arg0: i32) -> (i32, i32) {
    %c0_i32 = arith.constant 0 : i32
    %c0_i32_0 = arith.constant 0 : i32
    %c0_i32_1 = arith.constant 0 : i32
    return %c0_i32, %c0_i32_0 : i32, i32
  }
  func.func @transform_4(%arg0: i32) -> (i32, i32) {
    %c0_i32 = arith.constant 0 : i32
    %c0_i32_0 = arith.constant 0 : i32
    return %arg0, %c0_i32 : i32, i32
  }
}

</mosaic_0001>

<bundles_post_ra>
// kernel: _forward_impl.1
= control target key start
LH: loop header
LB: loop body
LE: loop exit
PB: predicated region body
PF: predicated region fallthrough
CT: control target
= control target key end

     0   :  { %9 = vsyncpa [#allocation3], 0  ;;  %s719_s0 = inlined_call_operand.vmem [shape: bf16[16,128], index: 0, kind: input, shape index: {}]   ;;  %s720_s1 = inlined_call_operand.hbm [shape: bf16[2,128,128], index: 1, kind: input, shape index: {}]   ;;  %s721_s2 = inlined_call_operand.hbm [shape: bf16[256,128], index: 2, kind: input, shape index: {}]   ;;  %s722_s3 = inlined_call_operand.vmem [shape: f32[8,128], index: 3, kind: input, shape index: {}]   ;;  %s723_s4 = inlined_call_operand.vmem [shape: f32[16,128], index: 4, kind: output, shape index: {}]  }
   0x1   :  { %10 = vsyncpa [#allocation5], 0  ;;  %s650_s15 = smov [#allocation2]  }
   0x2   :  { %s18_s16 = sshll.u32 %s650_s15, 4  ;;  %s19_s16 = int_to_ptr.vmem [resolvable:$true] %s18_s16 }
   0x3   :  { %s614_s17 = scalar_lea.vmem %s19_s16, 2048  ;;  %p619_p1 = scmp.lt.s32.totalorder %s19_s16, %s19_s16 }
   0x4   :  { %p615_p0 = scmp.ne.s32.totalorder %s19_s16, %s614_s17  ;;  %p620_p2 = scmp.lt.s32.totalorder %s614_s17, %s614_s17 }
   0x6   :  { %p621_p3 = por %p620_p2, %p619_p1 }
   0x8   :  { %p622_p4 = pnand %p621_p3, %p615_p0 }
   0xa   :  { %625 = shalt.err (!%p622_p4)
}
   0xb   :  { %s651_s18 = smov 64   ;;  %s652_s19 = smov 4  }
   0xc   :  { %24 = dma.hbm_to_vmem [thread:$0]  %s720_s1, 2048, %s19_s16, [#allocation3], %s651_s18, %s651_s18, %s652_s19  }
   0xd   :  { %s653_s22 = smov [#allocation4]  }
   0xe   :  { %s30_s23 = sshll.u32 %s653_s22, 4  ;;  %s31_s23 = int_to_ptr.vmem [resolvable:$true] %s30_s23 }
   0xf   :  { %s634_s24 = scalar_lea.vmem %s31_s23, 2048  ;;  %p639_p6 = scmp.lt.s32.totalorder %s31_s23, %s31_s23 }
  0x10   :  { %p635_p5 = scmp.ne.s32.totalorder %s31_s23, %s634_s24  ;;  %p640_p7 = scmp.lt.s32.totalorder %s634_s24, %s634_s24 }
  0x12   :  { %p641_p8 = por %p640_p7, %p639_p6 }
  0x14   :  { %p642_p9 = pnand %p641_p8, %p635_p5 }
  0x16   :  { %645 = shalt.err (!%p642_p9)
}
  0x17   :  { %36 = dma.hbm_to_vmem [thread:$0]  %s721_s2, 2048, %s31_s23, [#allocation5], %s651_s18, %s651_s18, %s652_s19  }
  0x18   :  { %646 = dma.done.wait [#allocation3], 2048  }
  0x19   :  { %647 = vsyncadd [#allocation3], 4294965248 }
  0x1a   :  { %648 = dma.done.wait [#allocation5], 2048  }
  0x1b   :  { %649 = vsyncadd [#allocation5], 4294965248  ;;  %v654_v0 = vmov 0.0   ;;  %vm655_vm0 = vmmov 0   ;;  %v573_v1 = vld [vmem:[#allocation2 + $0x38] sm:$0xff]   ;;  %v574_v2 = vld [vmem:[#allocation2 + $0x30] sm:$0xff]  }
  0x1c   :  { %527 = vmatprep.subr.bf16.mxu0 %v654_v0  ;;  %543 = vmatprep.mubr.msk.bf16.mxu0 %vm655_vm0, %v654_v0  ;;  %v575_v3 = vld [vmem:[#allocation2 + $0x28] sm:$0xff]   ;;  %v576_v4 = vld [vmem:[#allocation2 + $0x20] sm:$0xff]   ;;  %v582_v6 = vld [vmem:[#allocation4 + $0x78] sm:$0xff]  }
  0x1d   :  { %528 = vmatpush3.bf16.msra.mxu0 %v573_v1  ;;  %v581_v5 = vld [vmem:[%s719_s0] sm:$0xff]   ;;  %v583_v7 = vld [vmem:[#allocation4 + $0x38] sm:$0xff]   ;;  %496 = vmatprep.subr.bf16.mxu1 %v582_v6  ;;  %v584_v8 = vld [vmem:[#allocation4 + $0x70] sm:$0xff]  }
  0x1e   :  { %529 = vmatprep.subr.bf16.mxu0 %v654_v0  ;;  %322 = vmatprep.mubr.bf16.mxu1 %v581_v5  ;;  %v585_v9 = vld [vmem:[#allocation4 + $0x30] sm:$0xff]   ;;  %v586_v10 = vld [vmem:[#allocation4 + $0x68] sm:$0xff]   ;;  %v577_v11 = vld [vmem:[#allocation2 + $0x18] sm:$0xff]  }
  0x1f   :  { %497 = vmatpush3.bf16.msra.mxu1 %v583_v7  ;;  %v587_v12 = vld [vmem:[#allocation4 + $0x28] sm:$0xff]   ;;  %v588_v13 = vld [vmem:[#allocation4 + $0x60] sm:$0xff]   ;;  %v578_v14 = vld [vmem:[#allocation2 + $0x10] sm:$0xff]  }
  0x20   :  { %498 = vmatprep.subr.bf16.mxu1 %v584_v8  ;;  %v589_v15 = vld [vmem:[#allocation4 + $0x20] sm:$0xff]   ;;  %v579_v16 = vld [vmem:[#allocation2 + $0x8] sm:$0xff]   ;;  %v590_v17 = vld [vmem:[#allocation4 + $0x58] sm:$0xff]  }
  0x21   :  { %530 = vmatpush3.bf16.msra.mxu0 %v574_v2  ;;  %v591_v18 = vld [vmem:[#allocation4 + $0x18] sm:$0xff]   ;;  %v592_v19 = vld [vmem:[#allocation4 + $0x50] sm:$0xff]   ;;  %v580_v20 = vld [vmem:[#allocation2] sm:$0xff]  }
  0x22   :  { %531 = vmatprep.subr.bf16.mxu0 %v654_v0  ;;  %v593_v21 = vld [vmem:[#allocation4 + $0x10] sm:$0xff]   ;;  %v594_v22 = vld [vmem:[#allocation4 + $0x48] sm:$0xff]   ;;  %v596_v24 = vld [vmem:[#allocation4 + $0x40] sm:$0xff]  }
  0x23   :  { %499 = vmatpush3.bf16.msra.mxu1 %v585_v9  ;;  %v595_v23 = vld [vmem:[#allocation4 + $0x8] sm:$0xff]   ;;  %v597_v25 = vld [vmem:[#allocation4] sm:$0xff]   ;;  %v598_v26 = vld [vmem:[#allocation2 + $0x78] sm:$0xff]  }
  0x24   :  { %500 = vmatprep.subr.bf16.mxu1 %v586_v10  ;;  %v599_v27 = vld [vmem:[#allocation2 + $0x70] sm:$0xff]   ;;  %v600_v28 = vld [vmem:[#allocation2 + $0x68] sm:$0xff]   ;;  %v601_v29 = vld [vmem:[#allocation2 + $0x60] sm:$0xff]  }
  0x25   :  { %532 = vmatpush3.bf16.msra.mxu0 %v575_v3  ;;  %v602_v30 = vld [vmem:[#allocation2 + $0x58] sm:$0xff]   ;;  %v603_v38 = vld [vmem:[#allocation2 + $0x50] sm:$0xff]   ;;  %v604_v39 = vld [vmem:[#allocation2 + $0x48] sm:$0xff]  }
  0x26   :  { %533 = vmatprep.subr.bf16.mxu0 %v654_v0  ;;  %v605_v40 = vld [vmem:[#allocation2 + $0x40] sm:$0xff]  }
  0x27   :  { %501 = vmatpush3.bf16.msra.mxu1 %v587_v12  ;;  %v478_v50 = vld [vmem:[%s722_s3] ss:$0 sm:$0xff] }
  0x28   :  { %502 = vmatprep.subr.bf16.mxu1 %v588_v13 }
  0x29   :  { %534 = vmatpush3.bf16.msra.mxu0 %v576_v4 }
  0x2a   :  { %535 = vmatprep.subr.bf16.mxu0 %v654_v0 }
  0x2b   :  { %503 = vmatpush3.bf16.msra.mxu1 %v589_v15 }
  0x2c   :  { %504 = vmatprep.subr.bf16.mxu1 %v590_v17 }
  0x2d   :  { %536 = vmatpush3.bf16.msra.mxu0 %v577_v11 }
  0x2e   :  { %537 = vmatprep.subr.bf16.mxu0 %v654_v0 }
  0x2f   :  { %505 = vmatpush3.bf16.msra.mxu1 %v591_v18 }
  0x30   :  { %506 = vmatprep.subr.bf16.mxu1 %v592_v19 }
  0x31   :  { %538 = vmatpush3.bf16.msra.mxu0 %v578_v14 }
  0x32   :  { %539 = vmatprep.subr.bf16.mxu0 %v654_v0 }
  0x33   :  { %507 = vmatpush3.bf16.msra.mxu1 %v593_v21 }
  0x34   :  { %508 = vmatprep.subr.bf16.mxu1 %v594_v22 }
  0x35   :  { %540 = vmatpush3.bf16.msra.mxu0 %v579_v16 }
  0x36   :  { %541 = vmatprep.subr.bf16.mxu0 %v654_v0 }
  0x37   :  { %509 = vmatpush3.bf16.msra.mxu1 %v595_v23 }
  0x38   :  { %510 = vmatprep.subr.bf16.mxu1 %v596_v24 }
  0x39   :  { %542 = vmatpush3.bf16.msra.mxu0 %v580_v20 }
  0x3a   :  { %547 = vmatprep.subr.bf16.mxu0 %v654_v0 }
  0x3b   :  { %511 = vmatpush3.bf16.msra.mxu1 %v597_v25 }
  0x3c   :  { %544 = vmatmul.mubr.bf16.vlgmr.msra.gmra.mxu0 %v581_v5 }
  0x3d   :  { %563 = vmatprep.mubr.msk.bf16.mxu0 %vm655_vm0, %v654_v0  ;;  %548 = vmatpush3.bf16.msra.mxu0 %v598_v26 }
  0x3e   :  { %549 = vmatprep.subr.bf16.mxu0 %v654_v0 }
  0x41   :  { %550 = vmatpush3.bf16.msra.mxu0 %v599_v27 }
  0x42   :  { %551 = vmatprep.subr.bf16.mxu0 %v654_v0 }
  0x45   :  { %552 = vmatpush3.bf16.msra.mxu0 %v600_v28 }
  0x46   :  { %553 = vmatprep.subr.bf16.mxu0 %v654_v0 }
  0x49   :  { %554 = vmatpush3.bf16.msra.mxu0 %v601_v29 }
  0x4a   :  { %555 = vmatprep.subr.bf16.mxu0 %v654_v0 }
  0x4d   :  { %556 = vmatpush3.bf16.msra.mxu0 %v602_v30 }
  0x4e   :  { %557 = vmatprep.subr.bf16.mxu0 %v654_v0 }
  0x51   :  { %558 = vmatpush3.bf16.msra.mxu0 %v603_v38 }
  0x52   :  { %559 = vmatprep.subr.bf16.mxu0 %v654_v0 }
  0x55   :  { %560 = vmatpush3.bf16.msra.mxu0 %v604_v39 }
  0x56   :  { %561 = vmatprep.subr.bf16.mxu0 %v654_v0 }
  0x59   :  { %562 = vmatpush3.bf16.msra.mxu0 %v605_v40 }
  0xfc   :  { %v152_v31 = vpop.f32.mrf.mxu0 }
  0xfd   :  { %v159_v34 = vmax.f32 %v152_v31, 0.0 }
  0xfe   :  { %v545_v32 = vpop.f32.mrf.mxu0 }
 0x100   :  { %v155_v33 = vpop.f32.mrf.mxu0 }
 0x101   :  { %v160_v35 = vmax.f32 %v155_v33, 0.0 }
 0x102   :  { %v546_v36 = vpop.f32.mrf.mxu0 }
 0x103   :  { %v161_v37 = vpack.c.bf16 %v160_v35, %v159_v34 }
 0x105   :  { %323 = vmatmul.mubr.bf16.vlgmr.msra.gmra.mxu1 %v161_v37 }
 0x1c5   :  { %v512_v41 = vpop.f32.mrf.mxu1 }
 0x1c7   :  { %v513_v42 = vpop.f32.mrf.mxu1 }
 0x1c8   :  { %v514_v44 = vadd.f32 %v513_v42, %v512_v41 }
 0x1c9   :  { %v515_v43 = vpop.f32.mrf.mxu1 }
 0x1ca   :  { %v331_v47 = vmax.f32 %v514_v44, 0.0 }
 0x1cb   :  { %v516_v45 = vpop.f32.mrf.mxu1 }
 0x1cc   :  { %v517_v46 = vadd.f32 %v516_v45, %v515_v43 }
 0x1ce   :  { %v332_v48 = vmax.f32 %v517_v46, 0.0 }
 0x1d0   :  { %v333_v49 = vpack.c.bf16 %v332_v48, %v331_v47 }
 0x1d2   :  { %564 = vmatmul.mubr.bf16.vlgmr.msra.gmra.mxu0 %v333_v49 }
 0x292   :  { %v438_v51 = vpop.f32.mrf.mxu0 }
 0x293   :  { %v439_v52 = vadd.f32 %v478_v50, %v438_v51 }
 0x294   :  { %v565_v53 = vpop.f32.mrf.mxu0 }
 0x295   :  { %445 = vst [vmem:[%s723_s4] sm:$0xff] %v439_v52 }
 0x296   :  { %v441_v54 = vpop.f32.mrf.mxu0 }
 0x297   :  { %v442_v55 = vadd.f32 %v478_v50, %v441_v54 }
 0x298   :  { %v566_v56 = vpop.f32.mrf.mxu0 }
 0x299   :  { %446 = vst [vmem:[%s723_s4 + $0x8] sm:$0xff] %v442_v55 }
 0x29a   :  { %451 = vsyncpa [#allocation3], 1 }
 0x29b   :  { %452 = vsyncpa [#allocation5], 1 }

</bundles_post_ra>
